<compile_context>
chip_gen: v5e
topology: v5e:2x2
jax: 0.10.0
libtpu: 0.0.40
codegen_flags: <defaults>
</compile_context>

<pallas_src>
import functools

import jax
import jax.numpy as jnp
import numpy as np
from jax.experimental import pallas as pl
from jax.experimental.pallas import tpu as pltpu

LN_EPS = 1e-5
_PARAM_ROWS = 8  # ln_w, ln_b, tmk, 1-tmk, tmr, 1-tmr, pad, pad


# --------------------------------------------------------------------------
# Kernel
# --------------------------------------------------------------------------
def _rwkv_cmix_kernel(x_ref, p_ref, wk_ref, wr_ref, wv_ref, out_ref,
                      xk_ref, xr_ref, acc_ref, carry_ref, *, seq_block):
    """Grid = (batch_blocks, t_blocks, h_blocks); x_ref/out_ref are (R, C)."""
    R, C = x_ref.shape
    t = pl.program_id(1)
    h = pl.program_id(2)

    # ---- once per (b, t) block: LayerNorm, token shift, time-mix -------------
    @pl.when(h == 0)
    def _():
        x = x_ref[...].astype(jnp.float32)                       # (R, C)
        mean = jnp.mean(x, axis=-1, keepdims=True)
        xc = x - mean
        var = jnp.mean(xc * xc, axis=-1, keepdims=True)
        xln = xc * jax.lax.rsqrt(var + LN_EPS) * p_ref[0:1, :] + p_ref[1:2, :]

        # Token shift: last[r] = xln[r-1]; rows that start a sequence
        # (r % seq_block == 0) take the carry from the previous T-block,
        # which is zero when this is the first T-block of the sequence.
        prev = jnp.where(t == 0, 0.0, carry_ref[...])            # (1, C)
        rolled = pltpu.roll(xln, shift=1, axis=0)                # XLU, cheap
        seq_start = (jax.lax.broadcasted_iota(jnp.int32, (R, 1), 0)
                     % seq_block) == 0                           # (R, 1) column
        last = jnp.where(seq_start, prev, rolled)
        carry_ref[...] = xln[R - 1:R, :]                         # carry for next t

        xk_ref[...] = (xln * p_ref[2:3, :] + last * p_ref[3:4, :]).astype(jnp.bfloat16)
        xr_ref[...] = (xln * p_ref[4:5, :] + last * p_ref[5:6, :]).astype(jnp.bfloat16)
        acc_ref[...] = jnp.zeros_like(acc_ref)

    # ---- per H block: key -> relu^2 -> value partial (bf16 MXU, f32 acc) -----
    k = jnp.dot(xk_ref[...], wk_ref[...], preferred_element_type=jnp.float32)
    k = jnp.square(jnp.maximum(k, 0.0))
    acc_ref[...] += jnp.dot(k.astype(jnp.bfloat16), wv_ref[...],
                            preferred_element_type=jnp.float32)

    # ---- finalize on the last H block: receptance gate and store -------------
    @pl.when(h == pl.num_programs(2) - 1)
    def _():
        r = jax.nn.sigmoid(jnp.dot(xr_ref[...], wr_ref[...],
                                   preferred_element_type=jnp.float32))
        out_ref[...] = (r * acc_ref[...]).astype(out_ref.dtype)


# --------------------------------------------------------------------------
# Tiling / VMEM sizing helpers (all static Python, run at trace time)
# --------------------------------------------------------------------------
def _vmem_budget():
    """(usable bytes for tile sizing, physical capacity), conservative fallback."""
    cap = 64 * 2 ** 20                      # v7x per-core VMEM; safe lower bound
    try:
        cap = int(pltpu.get_tpu_info().vmem_capacity_bytes)
    except Exception:
        pass
    return max(cap - 12 * 2 ** 20, 8 * 2 ** 20), cap


def _footprint(rows, ht, C, H, x_isize, out_isize):
    """Estimated VMEM bytes for one pipelined step."""
    nh = H // ht
    wbuf = 1 if nh == 1 else 2              # resident vs double-buffered weights
    weights = wbuf * (C * ht + ht * C) * 2 + C * C * 2 + _PARAM_ROWS * C * 4
    act = 2 * rows * C * (x_isize + out_isize)            # in + out, double-buffered
    scratch = rows * C * (4 + 2 + 2) + 8 * C * 4          # acc f32, xk/xr bf16, carry
    interm = rows * (ht + 2 * C) * 4                      # k tile + live f32 temps
    return weights + act + scratch + interm


def _select_tiles(B, T, C, H, budget, x_isize, out_isize, target_rows=1024):
    """Pick (batch_block, seq_block, hidden_block) under the VMEM budget.

    Row blocks are contiguous rows of the flattened (B*T, C) activations:
    (1, seq_block) tiles the sequence (long-T prefill), (batch_block, T) tiles
    the batch when T itself is small.
    """
    row_cands = set()
    for tt in range(8, min(T, target_rows) + 1, 8):
        if T % tt == 0:
            row_cands.add((1, tt))
    if T <= target_rows:
        row_cands.add((1, T))
        for bb in range(1, B + 1):
            if B % bb == 0 and bb * T <= target_rows and (bb * T) % 8 == 0:
                row_cands.add((bb, T))
    row_cands.add((B, T))                                   # whole array fallback
    row_cands = [(bb, tt) for bb, tt in row_cands
                 if (bb * tt) % 8 == 0 or bb * tt == B * T]

    ht_cands = sorted({d for d in range(128, H + 1, 128) if H % d == 0} | {H},
                      reverse=True)

    best, best_key = None, None
    for bb, tt in row_cands:
        rows = bb * tt
        for ht in ht_cands:
            if _footprint(rows, ht, C, H, x_isize, out_isize) > budget:
                continue
            key = (H // ht == 1,                    # weights fully resident
                   (B // bb) >= min(B, 2),          # >=2 batch blocks (v7x megacore)
                   rows, ht)
            if best_key is None or key > best_key:
                best, best_key = (bb, tt, ht), key
    if best is None:
        bb, tt = min(row_cands, key=lambda c: c[0] * c[1])
        best = (bb, tt, min(ht_cands))
    return best


# --------------------------------------------------------------------------
# Parameter preparation (call once at init; hoists casts out of the forward)
# --------------------------------------------------------------------------
def prepare_rwkv_cmix_params(ln_w, ln_b, time_mix_k, time_mix_r, wk_t, wr_t, wv_t):
    """Pack per-channel params into an (8, C) slab and cast weights to bf16."""
    C = ln_w.shape[-1]
    rows = [ln_w, ln_b, time_mix_k, 1.0 - time_mix_k, time_mix_r, 1.0 - time_mix_r]
    rows = [jnp.asarray(r, jnp.float32).reshape(1, C) for r in rows]
    params = jnp.concatenate(rows + [jnp.zeros((2, C), jnp.float32)], axis=0)
    return (params,
            wk_t.astype(jnp.bfloat16),
            wr_t.astype(jnp.bfloat16),
            wv_t.astype(jnp.bfloat16))


# --------------------------------------------------------------------------
# Forward wrapper
# --------------------------------------------------------------------------
@functools.partial(jax.jit, static_argnames=("block_b", "block_t", "block_h"))
def rwkv_channel_mixer(x, params, wk_b, wr_b, wv_b,
                       block_b=None, block_t=None, block_h=None):
    """x: [B, T, C]; params: packed (8, C) slab; w*_b: bf16 [in, out] weights.

    Returns (out [B, T, C], new_state [B, 1, C]) matching the PyTorch module.
    """
    B, T, C = x.shape
    H = wk_b.shape[1]

    budget, cap = _vmem_budget()
    bb, tt, ht = _select_tiles(B, T, C, H, budget,
                               x.dtype.itemsize, x.dtype.itemsize)
    if block_b is not None:
        bb = block_b
    if block_t is not None:
        tt = block_t
    if block_h is not None:
        ht = block_h

    assert B % bb == 0 and T % tt == 0 and H % ht == 0
    assert bb == 1 or tt == T, "batch blocking requires the full T per block"
    R = bb * tt
    assert R % 8 == 0 or R == B * T
    assert ht % 128 == 0 or ht == H

    n_bb, n_tb, n_hb = B // bb, T // tt, H // ht

    fp = _footprint(R, ht, C, H, x.dtype.itemsize, x.dtype.itemsize)
    vmem_limit = int(min(cap - 4 * 2 ** 20, max(2 * fp, 32 * 2 ** 20)))

    x2 = x.reshape(B * T, C)

    resident = dict(pipeline_mode=pl.Buffered(1))       # constant index_map
    w_mode = resident if n_hb == 1 else {}               # resident if one H block

    kernel = functools.partial(_rwkv_cmix_kernel, seq_block=tt)

    grid_spec = pltpu.PrefetchScalarGridSpec(
        num_scalar_prefetch=0,
        grid=(n_bb, n_tb, n_hb),
        in_specs=[
            pl.BlockSpec((R, C), lambda b, t, h: (b * n_tb + t, 0)),         # x rows
            pl.BlockSpec((_PARAM_ROWS, C), lambda b, t, h: (0, 0), **resident),
            pl.BlockSpec((C, ht), lambda b, t, h: (0, h), **w_mode),         # W_key^T
            pl.BlockSpec((C, C), lambda b, t, h: (0, 0), **resident),        # W_recep^T
            pl.BlockSpec((ht, C), lambda b, t, h: (h, 0), **w_mode),         # W_value^T
        ],
        out_specs=pl.BlockSpec((R, C), lambda b, t, h: (b * n_tb + t, 0)),
        scratch_shapes=[
            pltpu.VMEM((R, C), jnp.bfloat16),   # xk (cached across H blocks)
            pltpu.VMEM((R, C), jnp.bfloat16),   # xr
            pltpu.VMEM((R, C), jnp.float32),    # value accumulator
            pltpu.VMEM((1, C), jnp.float32),    # token-shift carry across T blocks
        ],
    )

    weight_bytes = 2 * (C * H + H * C) + 2 * C * C + 4 * _PARAM_ROWS * C
    weight_reads = weight_bytes if n_hb == 1 else weight_bytes * n_bb * n_tb
    cost = pl.CostEstimate(
        flops=2 * B * T * (C * H + C * C + H * C),
        transcendentals=B * T * C,
        bytes_accessed=2 * B * T * C * x.dtype.itemsize + weight_reads)

    out2 = pl.pallas_call(
        kernel,
        out_shape=jax.ShapeDtypeStruct((B * T, C), x.dtype),
        grid_spec=grid_spec,
        compiler_params=pltpu.CompilerParams(
            dimension_semantics=("parallel", "arbitrary", "arbitrary"),
            vmem_limit_bytes=vmem_limit),
        cost_estimate=cost,
    )(x2, params, wk_b, wr_b, wv_b)

    out = out2.reshape(B, T, C)

    # new_state = LayerNorm(x)[:, -1:, :]; O(B*C), cheaper wrapper-side than a
    # lane-sparse per-step store inside the kernel.
    xl = x[:, -1:, :].astype(jnp.float32)
    mean = jnp.mean(xl, axis=-1, keepdims=True)
    xc = xl - mean
    var = jnp.mean(xc * xc, axis=-1, keepdims=True)
    new_state = (xc * jax.lax.rsqrt(var + LN_EPS) * params[0, :]
                 + params[1, :]).astype(x.dtype)

    return out, new_state


# --------------------------------------------------------------------------
# Pure-JAX reference (mirrors the PyTorch forward; same bf16 matmuls)
# --------------------------------------------------------------------------
def _reference(x, ln_w, ln_b, tmk, tmr, wk_t, wr_t, wv_t):
    xf = x.astype(jnp.float32)
    mean = jnp.mean(xf, axis=-1, keepdims=True)
    xc = xf - mean
    var = jnp.mean(xc * xc, axis=-1, keepdims=True)
    xln = xc * jax.lax.rsqrt(var + LN_EPS) * ln_w + ln_b
    last = jnp.pad(xln[:, :-1], ((0, 0), (1, 0), (0, 0)))
    xk = (xln * tmk + last * (1 - tmk)).astype(jnp.bfloat16)
    xr = (xln * tmr + last * (1 - tmr)).astype(jnp.bfloat16)
    k = jnp.dot(xk, wk_t.astype(jnp.bfloat16), preferred_element_type=jnp.float32)
    k = jnp.square(jnp.maximum(k, 0.0))
    r = jax.nn.sigmoid(
        jnp.dot(xr, wr_t.astype(jnp.bfloat16), preferred_element_type=jnp.float32))
    v = jnp.dot(k.astype(jnp.bfloat16), wv_t.astype(jnp.bfloat16),
                preferred_element_type=jnp.float32)
    return (r * v).astype(x.dtype), xln[:, -1:, :].astype(x.dtype)


if __name__ == "__main__":
    # Small, lane-dense shapes consistent with the module: hidden=128, ratio 4.
    B, T, C = 2, 32, 128
    H = int(C * 4.0)
    layer_id = 3

    key = jax.random.PRNGKey(0)
    kx, kk, kr, kv = jax.random.split(key, 4)

    x = jax.random.normal(kx, (B, T, C), dtype=jnp.float32)

    # Deterministic parameter init (shapes from __init__ / _init_time_parameters).
    layer_weight = 0.3 + 0.5 * layer_id / 12.0
    time_mix_k = jnp.full((1, C), layer_weight, dtype=jnp.float32)
    time_mix_r = jnp.full((1, C), 1.0 - layer_weight, dtype=jnp.float32)
    ln_w = jnp.ones((1, C), dtype=jnp.float32)
    ln_b = jnp.zeros((1, C), dtype=jnp.float32)
    # nn.Linear weights are [out, in]; store transposed [in, out] for x @ W.
    wk_t = jax.random.uniform(kk, (C, H), jnp.float32, -1.0, 1.0) / np.sqrt(C)
    wr_t = jax.random.uniform(kr, (C, C), jnp.float32, -1.0, 1.0) / np.sqrt(C)
    wv_t = jax.random.uniform(kv, (H, C), jnp.float32, -1.0, 1.0) / np.sqrt(H)

    params, wk_b, wr_b, wv_b = prepare_rwkv_cmix_params(
        ln_w, ln_b, time_mix_k, time_mix_r, wk_t, wr_t, wv_t)

    ref_out, ref_state = _reference(
        x, ln_w, ln_b, time_mix_k, time_mix_r, wk_t, wr_t, wv_t)

    # 1) Auto-selected tiles (weights resident, one T block per batch element).
    out, new_state = rwkv_channel_mixer(x, params, wk_b, wr_b, wv_b)
    jax.block_until_ready((out, new_state))
    np.testing.assert_allclose(np.asarray(out), np.asarray(ref_out),
                               rtol=2e-3, atol=2e-3)
    np.testing.assert_allclose(np.asarray(new_state), np.asarray(ref_state),
                               rtol=1e-5, atol=1e-5)

    # 2) Forced small tiles: exercises the cross-T-block token-shift carry and
    #    the H-block reduction path with a (2, 4, 4) grid.
    out2, state2 = rwkv_channel_mixer(x, params, wk_b, wr_b, wv_b,
                                      block_b=1, block_t=8, block_h=128)
    jax.block_until_ready((out2, state2))
    np.testing.assert_allclose(np.asarray(out2), np.asarray(ref_out),
                               rtol=2e-3, atol=2e-3)
    np.testing.assert_allclose(np.asarray(state2), np.asarray(ref_state),
                               rtol=1e-5, atol=1e-5)

    print("KERNEL_OK")
</pallas_src>

<mosaic_0001>
module attributes {stable_mosaic.version = 11 : i64} {
  func.func @_rwkv_cmix_kernel(%arg0: i32, %arg1: i32, %arg2: i32, %arg3: memref<32x128xf32, #tpu.memory_space<vmem>>, %arg4: memref<8x128xf32, #tpu.memory_space<vmem>>, %arg5: memref<128x512xbf16, #tpu.memory_space<vmem>>, %arg6: memref<128x128xbf16, #tpu.memory_space<vmem>>, %arg7: memref<512x128xbf16, #tpu.memory_space<vmem>>, %arg8: memref<32x128xf32, #tpu.memory_space<vmem>>, %arg9: memref<32x128xbf16, #tpu.memory_space<vmem>>, %arg10: memref<32x128xbf16, #tpu.memory_space<vmem>>, %arg11: memref<32x128xf32, #tpu.memory_space<vmem>>, %arg12: memref<1x128xf32, #tpu.memory_space<vmem>>) attributes {dimension_semantics = [#tpu.dimension_semantics<parallel>, #tpu.dimension_semantics<arbitrary>, #tpu.dimension_semantics<arbitrary>], iteration_bounds = array<i64: 2, 1, 1>, scalar_prefetch = 0 : i64, scratch_operands = 4 : i64, tpu.core_type = #tpu.core_type<tc>, window_params = [{transform_indices = @transform_0, window_bounds = array<i64: 32, 128>}, {pipeline_mode = #tpu.pipeline_mode<synchronous>, transform_indices = @transform_1, window_bounds = array<i64: 8, 128>}, {pipeline_mode = #tpu.pipeline_mode<synchronous>, transform_indices = @transform_2, window_bounds = array<i64: 128, 512>}, {pipeline_mode = #tpu.pipeline_mode<synchronous>, transform_indices = @transform_3, window_bounds = array<i64: 128, 128>}, {pipeline_mode = #tpu.pipeline_mode<synchronous>, transform_indices = @transform_4, window_bounds = array<i64: 512, 128>}, {transform_indices = @transform_5, window_bounds = array<i64: 32, 128>}]} {
    %c0_i32 = arith.constant 0 : i32
    %0 = arith.cmpi eq, %arg2, %c0_i32 : i32
    %1 = arith.extui %0 : i1 to i32
    %c0_i32_0 = arith.constant 0 : i32
    %2 = arith.cmpi ne, %1, %c0_i32_0 : i32
    scf.if %2 {
      %c0_14 = arith.constant 0 : index
      %c0_15 = arith.constant 0 : index
      %18 = vector.load %arg3[%c0_14, %c0_15] : memref<32x128xf32, #tpu.memory_space<vmem>>, vector<32x128xf32>
      %cst_16 = arith.constant dense<0.000000e+00> : vector<32xf32>
      %19 = vector.multi_reduction <add>, %18, %cst_16 [1] : vector<32x128xf32> to vector<32xf32>
      %20 = vector.shape_cast %19 : vector<32xf32> to vector<32x1xf32>
      %cst_17 = arith.constant 1.280000e+02 : f32
      %21 = vector.broadcast %cst_17 : f32 to vector<32x1xf32>
      %22 = arith.divf %20, %21 : vector<32x1xf32>
      %23 = vector.broadcast %22 : vector<32x1xf32> to vector<32x128xf32>
      %24 = arith.subf %18, %23 : vector<32x128xf32>
      %25 = arith.mulf %24, %24 : vector<32x128xf32>
      %cst_18 = arith.constant dense<0.000000e+00> : vector<32xf32>
      %26 = vector.multi_reduction <add>, %25, %cst_18 [1] : vector<32x128xf32> to vector<32xf32>
      %27 = vector.shape_cast %26 : vector<32xf32> to vector<32x1xf32>
      %cst_19 = arith.constant 1.280000e+02 : f32
      %28 = vector.broadcast %cst_19 : f32 to vector<32x1xf32>
      %29 = arith.divf %27, %28 : vector<32x1xf32>
      %cst_20 = arith.constant 9.99999974E-6 : f32
      %30 = vector.broadcast %cst_20 : f32 to vector<32x1xf32>
      %31 = arith.addf %29, %30 : vector<32x1xf32>
      %32 = math.rsqrt %31 : vector<32x1xf32>
      %33 = vector.broadcast %32 : vector<32x1xf32> to vector<32x128xf32>
      %34 = arith.mulf %24, %33 : vector<32x128xf32>
      %c0_21 = arith.constant 0 : index
      %c0_22 = arith.constant 0 : index
      %35 = vector.load %arg4[%c0_21, %c0_22] : memref<8x128xf32, #tpu.memory_space<vmem>>, vector<1x128xf32>
      %36 = vector.broadcast %35 : vector<1x128xf32> to vector<32x128xf32>
      %37 = arith.mulf %34, %36 : vector<32x128xf32>
      %c1 = arith.constant 1 : index
      %c0_23 = arith.constant 0 : index
      %38 = vector.load %arg4[%c1, %c0_23] : memref<8x128xf32, #tpu.memory_space<vmem>>, vector<1x128xf32>
      %39 = vector.broadcast %38 : vector<1x128xf32> to vector<32x128xf32>
      %40 = arith.addf %37, %39 : vector<32x128xf32>
      %c0_i32_24 = arith.constant 0 : i32
      %41 = arith.cmpi eq, %arg1, %c0_i32_24 : i32
      %c0_25 = arith.constant 0 : index
      %c0_26 = arith.constant 0 : index
      %42 = vector.load %arg12[%c0_25, %c0_26] : memref<1x128xf32, #tpu.memory_space<vmem>>, vector<1x128xf32>
      %cst_27 = arith.constant 0.000000e+00 : f32
      %43 = vector.broadcast %cst_27 : f32 to vector<1x128xf32>
      %44 = arith.select %41, %43, %42 : vector<1x128xf32>
      %c1_i32 = arith.constant 1 : i32
      %45 = tpu.dynamic_rotate %40 by %c1_i32 dim 0 : vector<32x128xf32>, i32 -> vector<32x128xf32>
      %46 = tpu.iota {dimensions = array<i32: 0>} : vector<32x1xi32>
      %c32_i32 = arith.constant 32 : i32
      %c0_i32_28 = arith.constant 0 : i32
      %47 = arith.cmpi eq, %c32_i32, %c0_i32_28 : i32
      %c1_i32_29 = arith.constant 1 : i32
      %48 = arith.select %47, %c1_i32_29, %c32_i32 : i32
      %49 = vector.broadcast %48 : i32 to vector<32x1xi32>
      %50 = arith.remsi %46, %49 : vector<32x1xi32>
      %c0_i32_30 = arith.constant 0 : i32
      %51 = vector.broadcast %c0_i32_30 : i32 to vector<32x1xi32>
      %52 = arith.cmpi ne, %50, %51 : vector<32x1xi32>
      %c0_i32_31 = arith.constant 0 : i32
      %53 = vector.broadcast %c0_i32_31 : i32 to vector<32x1xi32>
      %54 = arith.cmpi slt, %50, %53 : vector<32x1xi32>
      %c0_i32_32 = arith.constant 0 : i32
      %55 = arith.cmpi slt, %48, %c0_i32_32 : i32
      %56 = vector.broadcast %55 : i1 to vector<32x1xi1>
      %57 = vector.broadcast %56 : vector<32x1xi1> to vector<32x1xi1>
      %58 = arith.xori %54, %57 : vector<32x1xi1>
      %59 = arith.andi %58, %52 : vector<32x1xi1>
      %60 = vector.broadcast %48 : i32 to vector<32x1xi32>
      %61 = arith.addi %50, %60 : vector<32x1xi32>
      %62 = arith.select %59, %61, %50 : vector<32x1xi1>, vector<32x1xi32>
      %c0_i32_33 = arith.constant 0 : i32
      %63 = vector.broadcast %c0_i32_33 : i32 to vector<32x1xi32>
      %64 = arith.cmpi eq, %62, %63 : vector<32x1xi32>
      %65 = vector.shape_cast %64 : vector<32x1xi1> to vector<32x1xi1>
      %66 = vector.broadcast %65 : vector<32x1xi1> to vector<32x128xi1>
      %67 = vector.shape_cast %44 : vector<1x128xf32> to vector<1x128xf32>
      %68 = vector.broadcast %67 : vector<1x128xf32> to vector<32x128xf32>
      %69 = arith.select %66, %68, %45 : vector<32x128xi1>, vector<32x128xf32>
      %70 = vector.extract_strided_slice %40 {offsets = [31, 0], sizes = [1, 128], strides = [1, 1]} : vector<32x128xf32> to vector<1x128xf32>
      %c0_34 = arith.constant 0 : index
      %c0_35 = arith.constant 0 : index
      %71 = vector.load %arg12[%c0_34, %c0_35] : memref<1x128xf32, #tpu.memory_space<vmem>>, vector<1x128xf32>
      tpu.vector_store %arg12[%c0_34, %c0_35], %70 {strides = array<i32>} : memref<1x128xf32, #tpu.memory_space<vmem>>, vector<1x128xf32>,
      %c2 = arith.constant 2 : index
      %c0_36 = arith.constant 0 : index
      %72 = vector.load %arg4[%c2, %c0_36] : memref<8x128xf32, #tpu.memory_space<vmem>>, vector<1x128xf32>
      %73 = vector.broadcast %72 : vector<1x128xf32> to vector<32x128xf32>
      %74 = arith.mulf %40, %73 : vector<32x128xf32>
      %c3 = arith.constant 3 : index
      %c0_37 = arith.constant 0 : index
      %75 = vector.load %arg4[%c3, %c0_37] : memref<8x128xf32, #tpu.memory_space<vmem>>, vector<1x128xf32>
      %76 = vector.broadcast %75 : vector<1x128xf32> to vector<32x128xf32>
      %77 = arith.mulf %69, %76 : vector<32x128xf32>
      %78 = arith.addf %74, %77 : vector<32x128xf32>
      %79 = arith.truncf %78 : vector<32x128xf32> to vector<32x128xbf16>
      %c0_38 = arith.constant 0 : index
      %c0_39 = arith.constant 0 : index
      %80 = vector.load %arg9[%c0_38, %c0_39] : memref<32x128xbf16, #tpu.memory_space<vmem>>, vector<32x128xbf16>
      tpu.vector_store %arg9[%c0_38, %c0_39], %79 {strides = array<i32>} : memref<32x128xbf16, #tpu.memory_space<vmem>>, vector<32x128xbf16>,
      %c4 = arith.constant 4 : index
      %c0_40 = arith.constant 0 : index
      %81 = vector.load %arg4[%c4, %c0_40] : memref<8x128xf32, #tpu.memory_space<vmem>>, vector<1x128xf32>
      %82 = vector.broadcast %81 : vector<1x128xf32> to vector<32x128xf32>
      %83 = arith.mulf %40, %82 : vector<32x128xf32>
      %c5 = arith.constant 5 : index
      %c0_41 = arith.constant 0 : index
      %84 = vector.load %arg4[%c5, %c0_41] : memref<8x128xf32, #tpu.memory_space<vmem>>, vector<1x128xf32>
      %85 = vector.broadcast %84 : vector<1x128xf32> to vector<32x128xf32>
      %86 = arith.mulf %69, %85 : vector<32x128xf32>
      %87 = arith.addf %83, %86 : vector<32x128xf32>
      %88 = arith.truncf %87 : vector<32x128xf32> to vector<32x128xbf16>
      %c0_42 = arith.constant 0 : index
      %c0_43 = arith.constant 0 : index
      %89 = vector.load %arg10[%c0_42, %c0_43] : memref<32x128xbf16, #tpu.memory_space<vmem>>, vector<32x128xbf16>
      tpu.vector_store %arg10[%c0_42, %c0_43], %88 {strides = array<i32>} : memref<32x128xbf16, #tpu.memory_space<vmem>>, vector<32x128xbf16>,
      %cst_44 = arith.constant 0.000000e+00 : f32
      %90 = vector.broadcast %cst_44 : f32 to vector<32x128xf32>
      %c0_45 = arith.constant 0 : index
      %c0_46 = arith.constant 0 : index
      %91 = vector.load %arg11[%c0_45, %c0_46] : memref<32x128xf32, #tpu.memory_space<vmem>>, vector<32x128xf32>
      tpu.vector_store %arg11[%c0_45, %c0_46], %90 {strides = array<i32>} : memref<32x128xf32, #tpu.memory_space<vmem>>, vector<32x128xf32>,
    } else {
    }
    %c0 = arith.constant 0 : index
    %c0_1 = arith.constant 0 : index
    %3 = vector.load %arg9[%c0, %c0_1] : memref<32x128xbf16, #tpu.memory_space<vmem>>, vector<32x128xbf16>
    %c0_2 = arith.constant 0 : index
    %c0_3 = arith.constant 0 : index
    %4 = vector.load %arg5[%c0_2, %c0_3] : memref<128x512xbf16, #tpu.memory_space<vmem>>, vector<128x512xbf16>
    %cst = arith.constant dense<0.000000e+00> : vector<32x512xf32>
    %5 = tpu.matmul %3, %4, %cst {dimension_numbers = #tpu.dot_dimension_numbers<[1], [0], [0], [1], [0, 0, 1, 1], [], []>} : vector<32x128xbf16>, vector<128x512xbf16>, vector<32x512xf32> -> vector<32x512xf32>
    %cst_4 = arith.constant 0.000000e+00 : f32
    %6 = vector.broadcast %cst_4 : f32 to vector<32x512xf32>
    %7 = arith.maximumf %5, %6 : vector<32x512xf32>
    %8 = arith.mulf %7, %7 : vector<32x512xf32>
    %c0_5 = arith.constant 0 : index
    %c0_6 = arith.constant 0 : index
    %9 = vector.load %arg11[%c0_5, %c0_6] : memref<32x128xf32, #tpu.memory_space<vmem>>, vector<32x128xf32>
    %10 = arith.truncf %8 : vector<32x512xf32> to vector<32x512xbf16>
    %c0_7 = arith.constant 0 : index
    %c0_8 = arith.constant 0 : index
    %11 = vector.load %arg7[%c0_7, %c0_8] : memref<512x128xbf16, #tpu.memory_space<vmem>>, vector<512x128xbf16>
    %cst_9 = arith.constant dense<0.000000e+00> : vector<32x128xf32>
    %12 = tpu.matmul %10, %11, %cst_9 {dimension_numbers = #tpu.dot_dimension_numbers<[1], [0], [0], [1], [0, 0, 1, 1], [], []>} : vector<32x512xbf16>, vector<512x128xbf16>, vector<32x128xf32> -> vector<32x128xf32>
    %13 = arith.addf %9, %12 : vector<32x128xf32>
    %c0_10 = arith.constant 0 : index
    %c0_11 = arith.constant 0 : index
    %14 = vector.load %arg11[%c0_10, %c0_11] : memref<32x128xf32, #tpu.memory_space<vmem>>, vector<32x128xf32>
    tpu.vector_store %arg11[%c0_10, %c0_11], %13 {strides = array<i32>} : memref<32x128xf32, #tpu.memory_space<vmem>>, vector<32x128xf32>,
    %c0_i32_12 = arith.constant 0 : i32
    %15 = arith.cmpi eq, %arg2, %c0_i32_12 : i32
    %16 = arith.extui %15 : i1 to i32
    %c0_i32_13 = arith.constant 0 : i32
    %17 = arith.cmpi ne, %16, %c0_i32_13 : i32
    scf.if %17 {
      %c0_14 = arith.constant 0 : index
      %c0_15 = arith.constant 0 : index
      %18 = vector.load %arg10[%c0_14, %c0_15] : memref<32x128xbf16, #tpu.memory_space<vmem>>, vector<32x128xbf16>
      %c0_16 = arith.constant 0 : index
      %c0_17 = arith.constant 0 : index
      %19 = vector.load %arg6[%c0_16, %c0_17] : memref<128x128xbf16, #tpu.memory_space<vmem>>, vector<128x128xbf16>
      %cst_18 = arith.constant dense<0.000000e+00> : vector<32x128xf32>
      %20 = tpu.matmul %18, %19, %cst_18 {dimension_numbers = #tpu.dot_dimension_numbers<[1], [0], [0], [1], [0, 0, 1, 1], [], []>} : vector<32x128xbf16>, vector<128x128xbf16>, vector<32x128xf32> -> vector<32x128xf32>
      %21 = arith.negf %20 : vector<32x128xf32>
      %22 = math.exp %21 : vector<32x128xf32>
      %cst_19 = arith.constant 1.000000e+00 : f32
      %23 = vector.broadcast %cst_19 : f32 to vector<32x128xf32>
      %24 = arith.addf %23, %22 : vector<32x128xf32>
      %25 = arith.divf %23, %24 : vector<32x128xf32>
      %c0_20 = arith.constant 0 : index
      %c0_21 = arith.constant 0 : index
      %26 = vector.load %arg11[%c0_20, %c0_21] : memref<32x128xf32, #tpu.memory_space<vmem>>, vector<32x128xf32>
      %27 = arith.mulf %25, %26 : vector<32x128xf32>
      %c0_22 = arith.constant 0 : index
      %c0_23 = arith.constant 0 : index
      %28 = vector.load %arg8[%c0_22, %c0_23] : memref<32x128xf32, #tpu.memory_space<vmem>>, vector<32x128xf32>
      tpu.vector_store %arg8[%c0_22, %c0_23], %27 {strides = array<i32>} : memref<32x128xf32, #tpu.memory_space<vmem>>, vector<32x128xf32>,
    } else {
    }
    return
  }
  func.func @transform_0(%arg0: i32, %arg1: i32, %arg2: i32) -> (i32, i32) {
    %c1_i32 = arith.constant 1 : i32
    %0 = arith.muli %arg0, %c1_i32 : i32
    %1 = arith.addi %0, %arg1 : i32
    %c0_i32 = arith.constant 0 : i32
    %c0_i32_0 = arith.constant 0 : i32
    return %1, %c0_i32 : i32, i32
  }
  func.func @transform_1(%arg0: i32, %arg1: i32, %arg2: i32) -> (i32, i32) {
    %c0_i32 = arith.constant 0 : i32
    %c0_i32_0 = arith.constant 0 : i32
    %c0_i32_1 = arith.constant 0 : i32
    return %c0_i32, %c0_i32_0 : i32, i32
  }
  func.func @transform_2(%arg0: i32, %arg1: i32, %arg2: i32) -> (i32, i32) {
    %c0_i32 = arith.constant 0 : i32
    %c0_i32_0 = arith.constant 0 : i32
    return %c0_i32, %arg2 : i32, i32
  }
  func.func @transform_3(%arg0: i32, %arg1: i32, %arg2: i32) -> (i32, i32) {
    %c0_i32 = arith.constant 0 : i32
    %c0_i32_0 = arith.constant 0 : i32
    %c0_i32_1 = arith.constant 0 : i32
    return %c0_i32, %c0_i32_0 : i32, i32
  }
  func.func @transform_4(%arg0: i32, %arg1: i32, %arg2: i32) -> (i32, i32) {
    %c0_i32 = arith.constant 0 : i32
    %c0_i32_0 = arith.constant 0 : i32
    return %arg2, %c0_i32 : i32, i32
  }
  func.func @transform_5(%arg0: i32, %arg1: i32, %arg2: i32) -> (i32, i32) {
    %c1_i32 = arith.constant 1 : i32
    %0 = arith.muli %arg0, %c1_i32 : i32
    %1 = arith.addi %0, %arg1 : i32
    %c0_i32 = arith.constant 0 : i32
    %c0_i32_0 = arith.constant 0 : i32
    return %1, %c0_i32 : i32, i32
  }
}

</mosaic_0001>

<bundles_post_ra>
// kernel: rwkv_channel_mixer.1
= control target key start
LH: loop header
LB: loop body
LE: loop exit
PB: predicated region body
PF: predicated region fallthrough
CT: control target
= control target key end

     0   :  { %s2749_s0 = inlined_call_operand.hbm [shape: f32[64,128], index: 0, kind: input, shape index: {}]   ;;  %s2750_s1 = inlined_call_operand.vmem [shape: f32[8,128], index: 1, kind: input, shape index: {}]   ;;  %s2751_s2 = inlined_call_operand.hbm [shape: bf16[128,512], index: 2, kind: input, shape index: {}]   ;;  %s2752_s3 = inlined_call_operand.hbm [shape: bf16[128,128], index: 3, kind: input, shape index: {}]   ;;  %s2753_s4 = inlined_call_operand.hbm [shape: bf16[512,128], index: 4, kind: input, shape index: {}]   ;;  %s2754_s5 = inlined_call_operand.hbm [shape: f32[64,128], index: 5, kind: output, shape index: {}]  }
   0x1   :  { %2755 = sst [smem:[#allocation19_spill]] %s2751_s2 }
   0x2   :  { %2756 = sst [smem:[#allocation20_spill]] %s2752_s3 }
   0x3   :  { %2757 = sst [smem:[#allocation21_spill]] %s2753_s4 }
   0x4   :  { %10 = vsyncpa [#allocation7], 0 }
   0x5   :  { %12 = vsyncpa [#allocation7 + $0x1], 0 }
   0x6   :  { %13 = vsyncpa [#allocation10], 0 }
   0x7   :  { %14 = vsyncpa [#allocation13], 0 }
   0x8   :  { %15 = vsyncpa [#allocation8], 0 }
   0x9   :  { %17 = vsyncpa [#allocation8 + $0x1], 0  ;;  %s2409_s18 = smov 0   ;;  %s2411_s19 = smov 0  }
   0xa   :  { %s2413_s20 = smov 0   ;;  %s2415_s21 = smov 0  }
   0xb   :  { %s2417_s22 = smov 0   ;;  %s2419_s23 = smov 0  }
   0xc LB: > { %s1582_s24 = sadd.s32 4294967295, %s2364_s23   ;;  %s1583_s25 = sadd.s32 4294967294, %s2364_s23   ;;  %s2364_s23 = sphi %s2419_s23, %s23_s23   ;;  %s2360_s22 = sphi %s2417_s22, %s2777_s22   ;;  %s2356_s21 = sphi %s2415_s21, %s2776_s21   ;;  %s2352_s20 = sphi %s2413_s20, %s2775_s20   ;;  %s2348_s19 = sphi %s2411_s19, %s2774_s19   ;;  %s2344_s18 = sphi %s2409_s18, %s2773_s18  }
   0xd   : > { %p64_p0 = scmp.ne.s32.totalorder %s2348_s19, %s2344_s18  ;;  %p2443_p1 = scmp.eq.s32.totalorder %s1582_s24, 0 }
   0xe   : > { %p2447_p2 = scmp.eq.s32.totalorder %s1582_s24, 1  ;;  %p190_p3 = scmp.eq.s32.totalorder %s1583_s25, 1 }
   0xf   : > { %p2453_p4 = por %p2443_p1, %p64_p0  ;;  %p1584_p5 = scmp.ge.s32.totalorder %s2364_s23, 1 }
  0x10   : > { %p2458_p6 = por %p190_p3, %p64_p0  ;;  %p197_p7 = scmp.lt.s32.totalorder %s2364_s23, 3 }
  0x11   : > { %s2762_s2 = sld [smem:[#allocation19_spill]]  ;;  %s2366_s9 = smov [#allocation9]  }
  0x12   : > { %p2466_p8 = pnand %p1584_p5, %p197_p7  ;;  %s216_s10 = sshll.u32 %s2366_s9, 4  ;;  %s217_s10 = int_to_ptr.vmem [resolvable:$true] %s216_s10 }
  0x13   : > { %p1588_p11 = scmp.ge.s32.totalorder %s2364_s23, 2  ;;  %s2765_s3 = sld [smem:[#allocation20_spill]] }
  0x14   : > { %p2035_p9 = pneg %p2466_p8  ;;  %s2367_s15 = smov 256  }
  0x15   : > { %s2368_s16 = smov 16   ;;  %s2369_s17 = smov [#allocation11]  }
  0x16   : > { %p2474_p10 = pnand %p2035_p9, %p2443_p1  ;;  %s230_s24 = sshll.u32 %s2369_s17, 4  ;;  %s231_s24 = int_to_ptr.vmem [resolvable:$true] %s230_s24 }
  0x17   : > { %s214_s7 = sshll.u32 %s2762_s2, 4  ;;  %s2370_s25 = smov 64   ;;  %s215_s7 = int_to_ptr.hbm [resolvable:$true] %s214_s7 }
  0x18   : > { %2038 = dma.hbm_to_vmem [thread:$0]  (!%p2474_p10), %s215_s7, 4096, %s217_s10, [#allocation10], %s2367_s15, %s2367_s15, %s2368_s16  }
  0x19   : > { %s228_s14 = sshll.u32 %s2765_s3, 4  ;;  %s2371_s30 = smov 4   ;;  %s229_s14 = int_to_ptr.hbm [resolvable:$true] %s228_s14 }
  0x1a   : > { %2041 = dma.hbm_to_vmem [thread:$0]  (!%p2474_p10), %s229_s14, 1024, %s231_s24, [#allocation10], %s2370_s25, %s2370_s25, %s2371_s30  }
  0x1b   : > { %s2766_s4 = sld [smem:[#allocation21_spill]]  ;;  %s2372_s13 = smov [#allocation12]  }
  0x1c   : > { %s247_s2 = sshll.u32 %s2372_s13, 4  ;;  %s51_s7 = sadd.s32 1, %s2352_s20  ;;  %s248_s2 = int_to_ptr.vmem [resolvable:$true] %s247_s2 }
  0x1d   : > { %s42_s10 = sadd.s32 1, %s2360_s22  ;;  %p58_p12 = scmp.ne.s32.totalorder %s2352_s20, %s2348_s19 }
  0x1e   : > { %p44_p13 = scmp.ge.s32.totalorder %s42_s10, 2  ;;  %p59_p0 = scmp.eq.s32.totalorder %s2364_s23, 0 }
  0x1f   : > { %p2498_p3 = por %p2447_p2, %p58_p12  ;;  %p2056_p5 = scmp.lt.s32.totalorder %s2364_s23, 2 }
  0x20   : > { %s2779_s10 = smov (%p44_p13, %s42_s10), 0  ;;  %p2505_p7 = por %p59_p0, %p58_p12 }
  0x21   : > { %s245_s12 = sshll.u32 %s2766_s4, 4  ;;  %s48_s11 = ssub.s32 %s2360_s22, %s2779_s10  ;;  %s246_s12 = int_to_ptr.hbm [resolvable:$true] %s245_s12 }
  0x22   : > { %2044 = dma.hbm_to_vmem [thread:$0]  (!%p2474_p10), %s246_s12, 4096, %s248_s2, [#allocation13], %s2370_s25, %s2370_s25, %s2371_s30  }
  0x23   : > { %s261_s2 = sand.u32 1, %s2352_s20   ;;  %p49_p9 = scmp.eq.s32.totalorder %s48_s11, 0 }
  0x24   : > { %s1589_s16 = sshll.u32 %s261_s2, 5  ;;  %s1911_s17 = sshll.u32 %s2360_s22, 5 }
  0x25   : > { %s2514_s27 = scalar_select %p49_p9, %s2352_s20, %s51_s7  }
  0x26   : > { %s271_s30 = scalar_lea.hbm %s2749_s0, %s1911_s17  ;;  %s265_s6 = scalar_lea.vmem [#allocation6], %s1589_s16 }
  0x27   : > { %s274_s9 = sshll.u32 %s265_s6, 4  ;;  %s272_s12 = sshll.u32 %s271_s30, 4  ;;  %s275_s9 = int_to_ptr.vmem [resolvable:$true] %s274_s9  ;;  %s273_s12 = int_to_ptr.hbm [resolvable:$true] %s272_s12 }
  0x28   : > { %p2046_p2 = pnand %p2056_p5, %p2505_p7  ;;  %s262_s13 = scalar_lea.sflag [#allocation7], %s261_s2 }
  0x29   : > { %s2373_s3 = smov 128   ;;  %s2374_s4 = smov 8  }
  0x2a   : > { %2048 = dma.hbm_to_vmem [thread:$0]  (!%p2046_p2), %s273_s12, 512, %s275_s9, %s262_s13, %s2373_s3, %s2373_s3, %s2374_s4  }
  0x2b   : > { %286 = sbr.rel (%p2466_p8) target bundleno = 690 (0x2b2), region = 40  ;;  %s2526_s7 = sand.u32 (!%p2466_p8), 1, %s2348_s19  }
  0x2c   : > { %s1593_s11 = sshll.u32 (!%p2466_p8), %s2526_s7, 5  ;;  %s289_s16 = scalar_lea.sflag (!%p2466_p8), [#allocation7], %s2526_s7 }
  0x2d   : > { %s292_s15 = scalar_lea.vmem (!%p2466_p8), [#allocation6], %s1593_s11 }
  0x30   : > { %2327 = dma.done.wait (%p2453_p4), %s289_s16, 512  }
  0x31   : > { %2329 = vsyncadd (%p2453_p4), %s289_s16, 4294966784 }
  0x32   : > { %2331 = dma.done.wait (%p2443_p1), [#allocation10], 5120  }
  0x33   : > { %2333 = vsyncadd (%p2443_p1), [#allocation10], 4294962176 }
  0x34   : > { %2335 = dma.done.wait (%p2443_p1), [#allocation13], 4096  }
  0x35   : > { %2337 = vsyncadd (%p2443_p1), [#allocation13], 4294963200  ;;  %v346_v0 = vld [vmem:[%s292_s15 + $0x8] sm:$0xff]  ;;  %v345_v1 = vld [vmem:[%s292_s15] sm:$0xff]  ;;  %v2375_v4 = vmov 128.0   ;;  %s1988_s12 = sshll.u32 %s2356_s21, 5 }
  0x36   : > { %351 = vadd.xlane.f32.xlu1 %v346_v0  ;;  %349 = vadd.xlane.f32.xlu0 %v345_v1  ;;  %v347_v2 = vld [vmem:[%s292_s15 + $0x10] sm:$0xff]  ;;  %v348_v3 = vld [vmem:[%s292_s15 + $0x18] sm:$0xff]  ;;  %2128 = vrcp.f32 %v2375_v4  ;;  %v1720_v27 = vld [vmem:[#allocation9 + $0xe0] sm:$0xf]  ;;  %s2699_s13 = scalar_lea.vmem [#allocation14], %s1593_s11  ;;  %s1459_s11 = scalar_lea.hbm %s2754_s5, %s1988_s12 }
  0x37   : > { %v1944_v28 = vld [vmem:[#allocation9 + $0xec] sm:$0xf0]  ;;  %v1942_v29 = vld [vmem:[#allocation9 + $0xe4] sm:$0xf]  ;;  %v1722_v31 = vld [vmem:[#allocation9 + $0xf0] sm:$0xf0] }
  0x38   : > { %v1721_v30 = vor.u32 %v1944_v28, %v1720_v27  ;;  %v1728_v32 = vld [vmem:[#allocation9 + $0xe8] sm:$0xf]  ;;  %v1945_v33 = vld [vmem:[#allocation9 + $0xf4] sm:$0xf0]  ;;  %v1725_v34 = vor.u32 %v1942_v29, %v1722_v31  ;;  %v1943_v36 = vld [vmem:[#allocation9 + $0xec] sm:$0xf] }
  0x39   : > { %v1729_v35 = vor.u32 %v1945_v33, %v1728_v32  ;;  %v1730_v37 = vld [vmem:[#allocation9 + $0xf8] sm:$0xf0]  ;;  %v1704_v39 = vld [vmem:[#allocation9 + $0xc0] sm:$0xf]  ;;  %v1940_v40 = vld [vmem:[#allocation9 + $0xcc] sm:$0xf0] }
  0x3a   : > { %796 = vmatpush.bf16.msra.mxu0 %v1721_v30  ;;  %v1733_v38 = vor.u32 %v1943_v36, %v1730_v37  ;;  %815 = vmatpush.bf16.msra.mxu1 %v1725_v34  ;;  %v1705_v41 = vor.u32 %v1940_v40, %v1704_v39  ;;  %v1938_v42 = vld [vmem:[#allocation9 + $0xc4] sm:$0xf]  ;;  %v1706_v43 = vld [vmem:[#allocation9 + $0xd0] sm:$0xf0]  ;;  %v1712_v44 = vld [vmem:[#allocation9 + $0xc8] sm:$0xf] }
  0x3b   : > { %834 = vmatpush.bf16.msra.mxu2 %v1729_v35  ;;  %v1709_v47 = vor.u32 %v1938_v42, %v1706_v43  ;;  %v1941_v48 = vld [vmem:[#allocation9 + $0xd4] sm:$0xf0]  ;;  %v1939_v49 = vld [vmem:[#allocation9 + $0xcc] sm:$0xf]  ;;  %v1714_v50 = vld [vmem:[#allocation9 + $0xd8] sm:$0xf0] }
  0x3c   : > { %v2129_v5 = vpop.eup %2128  ;;  %853 = vmatpush.bf16.msra.mxu3 %v1733_v38  ;;  %v1713_v53 = vor.u32 %v1941_v48, %v1712_v44  ;;  %v1717_v54 = vor.u32 %v1939_v49, %v1714_v50  ;;  %v1688_v55 = vld [vmem:[#allocation9 + $0xa0] sm:$0xf]  ;;  %v1936_v56 = vld [vmem:[#allocation9 + $0xac] sm:$0xf0]  ;;  %v1934_v57 = vld [vmem:[#allocation9 + $0xa4] sm:$0xf] }
  0x3d   : > { %v358_v6 = vmul.f32 128.0, %v2129_v5  ;;  %vm362_vm0 = vweird.f32 %v2129_v5  ;;  %v1689_v60 = vor.u32 %v1936_v56, %v1688_v55  ;;  %v1690_v61 = vld [vmem:[#allocation9 + $0xb0] sm:$0xf0]  ;;  %v1696_v63 = vld [vmem:[#allocation9 + $0xa8] sm:$0xf]  ;;  %s1460_s15 = sshll.u32 %s2699_s13, 4  ;;  %s1461_s15 = int_to_ptr.vmem [resolvable:$true] %s1460_s15 }
  0x3e   : > { %353 = vadd.xlane.f32.xlu1 %v347_v2  ;;  %355 = vadd.xlane.f32.xlu0 %v348_v3  ;;  %v1693_v62 = vor.u32 %v1934_v57, %v1690_v61  ;;  %v1928_v27 = vld [vmem:[#allocation9 + $0x6c] sm:$0xf0]  ;;  %v1926_v28 = vld [vmem:[#allocation9 + $0x64] sm:$0xf]  ;;  %v1658_v33 = vld [vmem:[#allocation9 + $0x70] sm:$0xf0]  ;;  %v458_v61 = vlaneseq }
  0x3f   : > { %v359_v7 = vsub.f32 1.0, %v358_v6  ;;  %797 = vmatpush.bf16.msra.mxu0 %v1705_v41  ;;  %816 = vmatpush.bf16.msra.mxu1 %v1709_v47  ;;  %v1932_v6 = vld [vmem:[#allocation9 + $0x8c] sm:$0xf0]  ;;  %v1661_v35 = vor.u32 %v1926_v28, %v1658_v33  ;;  %v1664_v36 = vld [vmem:[#allocation9 + $0x68] sm:$0xf]  ;;  %s1462_s3 = sshll.u32 %s1459_s11, 4  ;;  %s1463_s3 = int_to_ptr.hbm [resolvable:$true] %s1462_s3 }
  0x40   : > { %835 = vmatpush.bf16.msra.mxu2 %v1713_v53  ;;  %854 = vmatpush.bf16.msra.mxu3 %v1717_v54  ;;  %v1929_v37 = vld [vmem:[#allocation9 + $0x74] sm:$0xf0]  ;;  %v1927_v38 = vld [vmem:[#allocation9 + $0x6c] sm:$0xf]  ;;  %v1666_v40 = vld [vmem:[#allocation9 + $0x78] sm:$0xf0] }
  0x41   : > { %v360_v8 = vmul.f32 %v2129_v5, %v359_v7  ;;  %v1665_v42 = vor.u32 %v1929_v37, %v1664_v36  ;;  %v1640_v43 = vld [vmem:[#allocation9 + $0x40] sm:$0xf]  ;;  %v1924_v44 = vld [vmem:[#allocation9 + $0x4c] sm:$0xf0]  ;;  %v1922_v48 = vld [vmem:[#allocation9 + $0x44] sm:$0xf] }
  0x42   : > { %v1641_v47 = vor.u32 %v1924_v44, %v1640_v43  ;;  %v1642_v49 = vld [vmem:[#allocation9 + $0x50] sm:$0xf0]  ;;  %v1648_v50 = vld [vmem:[#allocation9 + $0x48] sm:$0xf]  ;;  %v1925_v53 = vld [vmem:[#allocation9 + $0x54] sm:$0xf0] }
  0x43   : > { %v361_v9 = vadd.f32 %v2129_v5, %v360_v8  ;;  %798 = vmatpush.bf16.msra.mxu0 %v1689_v60  ;;  %817 = vmatpush.bf16.msra.mxu1 %v1693_v62  ;;  %v1930_v8 = vld [vmem:[#allocation9 + $0x84] sm:$0xf]  ;;  %v1923_v54 = vld [vmem:[#allocation9 + $0x4c] sm:$0xf]  ;;  %v1649_v56 = vor.u32 %v1925_v53, %v1648_v50  ;;  %v1650_v57 = vld [vmem:[#allocation9 + $0x58] sm:$0xf0] }
  0x44   : > { %v1653_v62 = vor.u32 %v1923_v54, %v1650_v57  ;;  %v1916_v28 = vld [vmem:[#allocation9 + $0xc] sm:$0xf0]  ;;  %v1610_v36 = vld [vmem:[#allocation9 + $0x10] sm:$0xf0]  ;;  %v1616_v37 = vld [vmem:[#allocation9 + $0x8] sm:$0xf] }
  0x45   : > { %v2544_v10 = vsel %vm362_vm0, %v2129_v5, %v361_v9  ;;  %v1672_v5 = vld [vmem:[#allocation9 + $0x80] sm:$0xf]  ;;  %v1674_v9 = vld [vmem:[#allocation9 + $0x90] sm:$0xf0]  ;;  %v1618_v43 = vld [vmem:[#allocation9 + $0x18] sm:$0xf0] }
  0x46   : > { %v1673_v7 = vor.u32 %v1932_v6, %v1672_v5  ;;  %v1918_v5 = vld [vmem:[#allocation9 + $0x24] sm:$0xf]  ;;  %v1626_v6 = vld [vmem:[#allocation9 + $0x30] sm:$0xf0]  ;;  %s1447_s4 = scalar_lea.sflag [#allocation8], %s2526_s7  ;;  %s2288_s26 = sshra.s32 %s1463_s3, 4  ;;  %s2289_s26 = int_to_ptr.hbm [resolvable:$true] %s2288_s26 }
  0x47   : > { %s2290_s28 = scalar_lea.hbm %s2289_s26, 32  ;;  %s2294_s17 = scalar_lea.hbm %s2754_s5, 64 }
  0x48   : > { %799 = vmatpush.bf16.msra.mxu0 %v1673_v7  ;;  %p2291_p1 = scmp.ne.s32.totalorder %s2289_s26, %s2290_s28  ;;  %p2295_p10 = scmp.lt.s32.totalorder %s2289_s26, %s2754_s5 }
  0x49   : > { %p2296_p12 = scmp.lt.s32.totalorder %s2294_s17, %s2290_s28 }
  0x4a   : > { %p2292_p4 = pnand %p2291_p1, %p2498_p3 }
  0x4b   : > { %p2297_p13 = por %p2296_p12, %p2295_p10 }
  0x4c   : > { %p2293_p8 = pneg %p2292_p4 }
  0x4e   : > { %p2298_p0 = pnand %p2297_p13, %p2293_p8 }
  0xa9   : > { %v352_v11 = vpop.xlane.xlu1 %351  ;;  %v350_v12 = vpop.xlane.xlu0 %349 }
  0xaa   : > { %v365_v13 = vmul.f32 %v2544_v10, %v352_v11  ;;  %v364_v14 = vmul.f32 %v2544_v10, %v350_v12 }
  0xac   : > { %v2548_v15 = vsub.f32 %v346_v0, %v365_v13  ;;  %v2550_v16 = vsub.f32 %v345_v1, %v364_v14  ;;  %v1937_v0 = vld [vmem:[#allocation9 + $0xb4] sm:$0xf0]  ;;  %v1935_v1 = vld [vmem:[#allocation9 + $0xac] sm:$0xf]  ;;  %v1677_v13 = vor.u32 %v1930_v8, %v1674_v9  ;;  %v1680_v14 = vld [vmem:[#allocation9 + $0x88] sm:$0xf] }
  0xae   : > { %v373_v17 = vmul.f32 %v2548_v15, %v2548_v15  ;;  %v372_v18 = vmul.f32 %v2550_v16, %v2550_v16  ;;  %818 = vmatpush.bf16.msra.mxu1 %v1677_v13  ;;  %v1921_v13 = vld [vmem:[#allocation9 + $0x34] sm:$0xf0] }
  0xb0   : > { %378 = vadd.xlane.f32.xlu0 %v373_v17  ;;  %376 = vadd.xlane.f32.xlu2 %v372_v18  ;;  %v1933_v17 = vld [vmem:[#allocation9 + $0x94] sm:$0xf0] }
  0xb1   : > { %v354_v19 = vpop.xlane.xlu1 %353  ;;  %v356_v20 = vpop.xlane.xlu0 %355 }
  0xb2   : > { %v366_v21 = vmul.f32 %v2544_v10, %v354_v19  ;;  %v367_v22 = vmul.f32 %v2544_v10, %v356_v20  ;;  %v1681_v20 = vor.u32 %v1933_v17, %v1680_v14  ;;  %819 = vmatpush.bf16.msra.mxu1 %v1661_v35  ;;  %v1919_v14 = vld [vmem:[#allocation9 + $0x2c] sm:$0xf]  ;;  %v2611_v17 = vld [vmem:[%s2750_s1 + $0x1] ss:$0 sm:$0xff] }
  0xb4   : > { %v2558_v23 = vsub.f32 %v347_v2, %v366_v21  ;;  %v2560_v24 = vsub.f32 %v348_v3, %v367_v22  ;;  %v1697_v2 = vor.u32 %v1937_v0, %v1696_v63  ;;  %v1698_v3 = vld [vmem:[#allocation9 + $0xb8] sm:$0xf0]  ;;  %v1931_v21 = vld [vmem:[#allocation9 + $0x8c] sm:$0xf]  ;;  %v1624_v63 = vld [vmem:[#allocation9 + $0x20] sm:$0xf] }
  0xb5   : > { %v1701_v4 = vor.u32 %v1935_v1, %v1698_v3  ;;  %v1682_v22 = vld [vmem:[#allocation9 + $0x98] sm:$0xf0]  ;;  %v1920_v0 = vld [vmem:[#allocation9 + $0x2c] sm:$0xf0] }
  0xb6   : > { %v374_v25 = vmul.f32 %v2558_v23, %v2558_v23  ;;  %v375_v26 = vmul.f32 %v2560_v24, %v2560_v24  ;;  %836 = vmatpush.bf16.msra.mxu2 %v1697_v2  ;;  %v2598_v2 = vld [vmem:[%s2750_s1] ss:$0 sm:$0xff] }
  0xb7   : > { %855 = vmatpush.bf16.msra.mxu3 %v1701_v4  ;;  %v1625_v4 = vor.u32 %v1920_v0, %v1624_v63 }
  0xb8   : > { %380 = vadd.xlane.f32.xlu1 %v374_v25  ;;  %382 = vadd.xlane.f32.xlu2 %v375_v26  ;;  %v1685_v25 = vor.u32 %v1931_v21, %v1682_v22  ;;  %v1656_v26 = vld [vmem:[#allocation9 + $0x60] sm:$0xf]  ;;  %v1634_v21 = vld [vmem:[#allocation9 + $0x38] sm:$0xf0] }
  0xb9   : > { %v1657_v32 = vor.u32 %v1928_v27, %v1656_v26  ;;  %v1608_v22 = vld [vmem:[#allocation9] sm:$0xf]  ;;  %v1637_v27 = vor.u32 %v1919_v14, %v1634_v21 }
  0xba   : > { %837 = vmatpush.bf16.msra.mxu2 %v1681_v20 }
  0xbb   : > { %856 = vmatpush.bf16.msra.mxu3 %v1685_v25  ;;  %800 = vmatpush.bf16.msra.mxu0 %v1657_v32  ;;  %v1914_v32 = vld [vmem:[#allocation9 + $0x4] sm:$0xf] }
  0xbe   : > { %838 = vmatpush.bf16.msra.mxu2 %v1665_v42  ;;  %v1915_v42 = vld [vmem:[#allocation9 + $0xc] sm:$0xf] }
  0xbf   : > { %801 = vmatpush.bf16.msra.mxu0 %v1641_v47 }
  0xc2   : > { %839 = vmatpush.bf16.msra.mxu2 %v1649_v56 }
  0xc3   : > { %802 = vmatpush.bf16.msra.mxu0 %v1625_v4 }
 0x123   : > { %v377_v45 = vpop.xlane.xlu2 %376  ;;  %v379_v46 = vpop.xlane.xlu0 %378 }
 0x124   : > { %v384_v51 = vmul.f32 %v377_v45, %v2544_v10  ;;  %v385_v52 = vmul.f32 %v379_v46, %v2544_v10  ;;  %v1669_v46 = vor.u32 %v1927_v38, %v1666_v40  ;;  %v1917_v38 = vld [vmem:[#allocation9 + $0x14] sm:$0xf0]  ;;  %v1613_v40 = vor.u32 %v1914_v32, %v1610_v36 }
 0x125   : > { %v1961_v36 = vld [vmem:[#allocation12 + $0x78] sm:$0xff] }
 0x126   : > { %v2568_v58 = vadd.f32 1e-05, %v384_v51  ;;  %v2570_v59 = vadd.f32 1e-05, %v385_v52  ;;  %v1645_v52 = vor.u32 %v1922_v48, %v1642_v49  ;;  %857 = vmatpush.bf16.msra.mxu3 %v1669_v46  ;;  %v459_v48 = vshrl.u32 %v458_v61, 7 }
 0x128   : > { %2130 = vrsqrt.f32 %v2568_v58  ;;  %820 = vmatpush.bf16.msra.mxu1 %v1645_v52  ;;  %vm408_vm2 = vweird.f32 %v2570_v59  ;;  %vm398_vm4 = vweird.f32 %v2568_v58  ;;  %vm460_vm13 = vcmp.lt.s32.totalorder %v459_v48, 1 }
 0x129   : > { %2132 = vrsqrt.f32 %v2570_v59  ;;  %v472_v56 = vand.u32 31, %v459_v48 }
 0x12a   : > { %858 = vmatpush.bf16.msra.mxu3 %v1653_v62  ;;  %v2127_v62 = vld [vmem:[%s2750_s1 + $0x5] ss:$0 sm:$0xff] }
 0x12b   : > { %v381_v11 = vpop.xlane.xlu1 %380  ;;  %v383_v12 = vpop.xlane.xlu2 %382  ;;  %vm2669_vm14 = vcmp.eq.s32.totalorder %v472_v56, 0  ;;  %v1957_v56 = vld [vmem:[#allocation12 + $0x58] sm:$0xff] }
 0x12c   : > { %v386_v18 = vmul.f32 %v381_v11, %v2544_v10  ;;  %v387_v19 = vmul.f32 %v383_v12, %v2544_v10  ;;  %v1629_v11 = vor.u32 %v1918_v5, %v1626_v6  ;;  %v1632_v12 = vld [vmem:[#allocation9 + $0x28] sm:$0xf] }
 0x12d   : > { %v1633_v20 = vor.u32 %v1921_v13, %v1632_v12 }
 0x12e   : > { %v2576_v29 = vpop.eup %2130  ;;  %v2578_v30 = vadd.f32 1e-05, %v386_v18  ;;  %v2580_v31 = vadd.f32 1e-05, %v387_v19  ;;  %821 = vmatpush.bf16.msra.mxu1 %v1629_v11  ;;  %859 = vmatpush.bf16.msra.mxu3 %v1637_v27 }
 0x12f   : > { %v2582_v34 = vpop.eup %2132  ;;  %v393_v10 = vmul.f32 %v2576_v29, %v2568_v58  ;;  %vm399_vm1 = vweird.f32 %v2576_v29  ;;  %840 = vmatpush.bf16.msra.mxu2 %v1633_v20 }
 0x130   : > { %v403_v39 = vmul.f32 %v2582_v34, %v2570_v59  ;;  %2134 = vrsqrt.f32 %v2578_v30  ;;  %vm409_vm3 = vweird.f32 %v2582_v34  ;;  %vm2615_vm5 = vmor %vm398_vm4, %vm399_vm1  ;;  %vm418_vm6 = vweird.f32 %v2578_v30 }
 0x131   : > { %v394_v41 = vmul.f32 %v2576_v29, %v393_v10  ;;  %2136 = vrsqrt.f32 %v2580_v31  ;;  %vm410_vm7 = vmor %vm408_vm2, %vm409_vm3  ;;  %vm428_vm11 = vweird.f32 %v2580_v31 }
 0x132   : > { %v404_v45 = vmul.f32 %v2582_v34, %v403_v39  ;;  %822 = vmatpush.bf16.msra.mxu1 %v1613_v40  ;;  %v1977_v40 = vld [vmem:[#allocation12 + $0xf8] sm:$0xff] }
 0x133   : > { %v395_v51 = vmul.f32 0.5, %v394_v41  ;;  %v1617_v41 = vor.u32 %v1917_v38, %v1616_v37 }
 0x134   : > { %v405_v55 = vmul.f32 0.5, %v404_v45 }
 0x135   : > { %v396_v60 = vsub.f32 1.5, %v395_v51  ;;  %841 = vmatpush.bf16.msra.mxu2 %v1617_v41 }
 0x136   : > { %v2593_v1 = vpop.eup %2134  ;;  %v406_v3 = vsub.f32 1.5, %v405_v55  ;;  %1191 = vmatpush.bf16.msrb.mxu1 %v1961_v36  ;;  %v1980_v36 = vld [vmem:[#allocation11] sm:$0xff] }
 0x137   : > { %v2602_v7 = vpop.eup %2136  ;;  %v397_v8 = vmul.f32 %v2576_v29, %v396_v60  ;;  %v413_v9 = vmul.f32 %v2593_v1, %v2578_v30  ;;  %vm419_vm8 = vweird.f32 %v2593_v1  ;;  %v2124_v60 = vld [vmem:[%s2750_s1 + $0x2] ss:$0 sm:$0xff] }
 0x138   : > { %v407_v58 = vmul.f32 %v2582_v34, %v406_v3  ;;  %v423_v19 = vmul.f32 %v2602_v7, %v2580_v31  ;;  %vm420_vm9 = vmor %vm418_vm6, %vm419_vm8  ;;  %vm429_vm10 = vweird.f32 %v2602_v7  ;;  %v2125_v31 = vld [vmem:[%s2750_s1 + $0x4] ss:$0 sm:$0xff]  ;;  %v2376_v3 = vmov 0.0  }
 0x139   : > { %v401_v25 = vsel %vm2615_vm5, %v2576_v29, %v397_v8  ;;  %v414_v26 = vmul.f32 %v2593_v1, %v413_v9  ;;  %v1609_v29 = vor.u32 %v1916_v28, %v1608_v22  ;;  %vm430_vm12 = vmor %vm428_vm11, %vm429_vm10  ;;  %v529_v4 = vperm.slane %v2376_v3, 0  ;;  %v1972_v3 = vld [vmem:[#allocation12 + $0xd0] sm:$0xff] }
 0x13a   : > { %v432_v33 = vmul.f32 %v401_v25, %v2550_v16  ;;  %v411_v10 = vsel %vm410_vm7, %v2582_v34, %v407_v58  ;;  %v424_v35 = vmul.f32 %v2602_v7, %v423_v19  ;;  %v1621_v16 = vor.u32 %v1915_v42, %v1618_v43 }
 0x13b   : > { %v433_v59 = vmul.f32 %v411_v10, %v2548_v15  ;;  %v415_v39 = vmul.f32 0.5, %v414_v26  ;;  %803 = vmatpush.bf16.msra.mxu0 %v1609_v29  ;;  %v1953_v29 = vld [vmem:[#allocation12 + $0x38] sm:$0xff] }
 0x13c   : > { %v438_v44 = vmul.f32 %v2598_v2, %v432_v33  ;;  %v425_v45 = vmul.f32 0.5, %v424_v35  ;;  %860 = vmatpush.bf16.msra.mxu3 %v1621_v16 }
 0x13d   : > { %v439_v34 = vmul.f32 %v2598_v2, %v433_v59  ;;  %v416_v46 = vsub.f32 1.5, %v415_v39  ;;  %v1969_v39 = vld [vmem:[#allocation12 + $0xb8] sm:$0xff] }
 0x13e   : > { %v444_v47 = vadd.f32 %v2611_v17, %v438_v44  ;;  %v426_v15 = vsub.f32 1.5, %v425_v45  ;;  %v1952_v44 = vld [vmem:[#allocation12 + $0x30] sm:$0xff]  ;;  %1210 = vmatpush.bf16.msrb.mxu2 %v1969_v39 }
 0x13f   : > { %v445_v49 = vadd.f32 %v2611_v17, %v439_v34  ;;  %v417_v50 = vmul.f32 %v2593_v1, %v416_v46  ;;  %1172 = vmatpush.bf16.msrb.mxu0 %v1953_v29  ;;  %v1960_v45 = vld [vmem:[#allocation12 + $0x70] sm:$0xff] }
 0x140   : > { %v427_v51 = vmul.f32 %v2602_v7, %v426_v15  ;;  %v454_v30 = vrot.slane %v444_v47, 7  ;;  %v538_v6 = vmul.f32 %v2124_v60, %v444_v47  ;;  %1229 = vmatpush.bf16.msrb.mxu3 %v1977_v40  ;;  %v1968_v34 = vld [vmem:[#allocation12 + $0xb0] sm:$0xff]  ;;  %1192 = vmatpush.bf16.msrb.mxu1 %v1960_v45 }
 0x141   : > { %v421_v52 = vsel %vm420_vm9, %v2593_v1, %v417_v50  ;;  %v455_v53 = vrot.slane %v445_v49, 7  ;;  %v539_v8 = vmul.f32 %v2124_v60, %v445_v49  ;;  %v563_v12 = vmul.f32 %v2125_v31, %v445_v49  ;;  %v1976_v46 = vld [vmem:[#allocation12 + $0xf0] sm:$0xff]  ;;  %v1951_v49 = vld [vmem:[#allocation12 + $0x28] sm:$0xff] }
 0x142   : > { %v434_v54 = vmul.f32 %v421_v52, %v2558_v23  ;;  %v431_v55 = vsel %vm430_vm12, %v2602_v7, %v427_v51  ;;  %v2126_v23 = vld [vmem:[%s2750_s1 + $0x3] ss:$0 sm:$0xff]  ;;  %v562_v7 = vmul.f32 %v2125_v31, %v444_v47  ;;  %v1959_v50 = vld [vmem:[#allocation12 + $0x68] sm:$0xff]  ;;  %1211 = vmatpush.bf16.msrb.mxu2 %v1968_v34  ;;  %v1964_v1 = vld [vmem:[#allocation12 + $0x90] sm:$0xff] }
 0x143   : > { %v435_v57 = vmul.f32 %v431_v55, %v2560_v24  ;;  %v463_v63 = vsel %vm460_vm13, %v454_v30, %v455_v53  ;;  %1173 = vmatpush.bf16.msrb.mxu0 %v1952_v44  ;;  %v1967_v51 = vld [vmem:[#allocation12 + $0xa8] sm:$0xff]  ;;  %v1949_v55 = vld [vmem:[#allocation12 + $0x18] sm:$0xff] }
 0x144   : > { %v440_v61 = vmul.f32 %v2598_v2, %v434_v54  ;;  %v545_v11 = vmul.f32 %v2126_v23, %v463_v63  ;;  %v569_v13 = vmul.f32 %v2127_v62, %v463_v63  ;;  %1230 = vmatpush.bf16.msrb.mxu3 %v1976_v46  ;;  %v1975_v52 = vld [vmem:[#allocation12 + $0xe8] sm:$0xff]  ;;  %1193 = vmatpush.bf16.msrb.mxu1 %v1959_v50 }
 0x145   : > { %v441_v24 = vmul.f32 %v2598_v2, %v435_v57  ;;  %v1947_v63 = vld [vmem:[#allocation12 + $0x8] sm:$0xff] }
 0x146   : > { %v446_v0 = vadd.f32 %v2611_v17, %v440_v61  ;;  %v549_v37 = vadd.f32 %v545_v11, %v539_v8  ;;  %v573_v41 = vadd.f32 %v569_v13, %v563_v12  ;;  %1212 = vmatpush.bf16.msrb.mxu2 %v1967_v51  ;;  %v1948_v61 = vld [vmem:[#allocation12 + $0x10] sm:$0xff]  ;;  %v1987_v8 = vld [vmem:[#allocation11 + $0x38] sm:$0xff]  ;;  %v1970_v11 = vld [vmem:[#allocation12 + $0xc0] sm:$0xff] }
 0x147   : > { %v447_v5 = vadd.f32 %v2611_v17, %v441_v24  ;;  %1174 = vmatpush.bf16.msrb.mxu0 %v1951_v49  ;;  %v1973_v24 = vld [vmem:[#allocation12 + $0xd8] sm:$0xff]  ;;  %v1986_v12 = vld [vmem:[#allocation11 + $0x30] sm:$0xff]  ;;  %v1985_v13 = vld [vmem:[#allocation11 + $0x28] sm:$0xff] }
 0x148   : > { %v456_v9 = vrot.slane %v446_v0, 7  ;;  %v540_v18 = vmul.f32 %v2124_v60, %v446_v0  ;;  %v564_v58 = vmul.f32 %v2125_v31, %v446_v0  ;;  %1231 = vmatpush.bf16.msrb.mxu3 %v1975_v52  ;;  %v1955_v0 = vld [vmem:[#allocation12 + $0x48] sm:$0xff] }
 0x149   : > { %v457_v2 = vrot.slane %v447_v5, 7  ;;  %v541_v19 = vmul.f32 %v2124_v60, %v447_v5  ;;  %v565_v27 = vmul.f32 %v2125_v31, %v447_v5  ;;  %v1966_v60 = vld [vmem:[#allocation12 + $0xa0] sm:$0xff] }
 0x14a   : > { %v462_v14 = vsel %vm460_vm13, %v455_v53, %v456_v9  ;;  %v1958_v53 = vld [vmem:[#allocation12 + $0x60] sm:$0xff]  ;;  %1213 = vmatpush.bf16.msrb.mxu2 %v1966_v60 }
 0x14b   : > { %v546_v20 = vmul.f32 %v2126_v23, %v462_v14  ;;  %v570_v21 = vmul.f32 %v2127_v62, %v462_v14  ;;  %v461_v22 = vsel %vm460_vm13, %v456_v9, %v457_v2  ;;  %v464_v25 = vsel %vm460_vm13, %v457_v2, %v454_v30  ;;  %v1950_v30 = vld [vmem:[#allocation12 + $0x20] sm:$0xff]  ;;  %1194 = vmatpush.bf16.msrb.mxu1 %v1958_v53 }
 0x14c   : > { %v531_v17 = vsel %vm2669_vm14, %v529_v4, %v464_v25  ;;  %v547_v26 = vmul.f32 %v2126_v23, %v461_v22  ;;  %v571_v28 = vmul.f32 %v2127_v62, %v461_v22  ;;  %1175 = vmatpush.bf16.msrb.mxu0 %v1950_v30  ;;  %v1974_v31 = vld [vmem:[#allocation12 + $0xe0] sm:$0xff] }
 0x14d   : > { %v550_v32 = vadd.f32 %v546_v20, %v540_v18  ;;  %v574_v33 = vadd.f32 %v570_v21, %v564_v58  ;;  %v544_v10 = vmul.f32 %v2126_v23, %v531_v17  ;;  %v568_v35 = vmul.f32 %v2127_v62, %v531_v17  ;;  %v1956_v23 = vld [vmem:[#allocation12 + $0x50] sm:$0xff]  ;;  %1232 = vmatpush.bf16.msrb.mxu3 %v1974_v31  ;;  %v1965_v62 = vld [vmem:[#allocation12 + $0x98] sm:$0xff]  ;;  %v1946_v4 = vld [vmem:[#allocation12] sm:$0xff] }
 0x14e   : > { %v551_v38 = vadd.f32 %v547_v26, %v541_v19  ;;  %v575_v59 = vadd.f32 %v571_v28, %v565_v27  ;;  %1214 = vmatpush.bf16.msrb.mxu2 %v1965_v62  ;;  %v1954_v5 = vld [vmem:[#allocation12 + $0x40] sm:$0xff]  ;;  %v1983_v58 = vld [vmem:[#allocation11 + $0x18] sm:$0xff]  ;;  %v1982_v19 = vld [vmem:[#allocation11 + $0x10] sm:$0xff] }
 0x14f   : > { %v548_v42 = vadd.f32 %v544_v10, %v538_v6  ;;  %v572_v43 = vadd.f32 %v568_v35, %v562_v7  ;;  %1195 = vmatpush.bf16.msrb.mxu1 %v1957_v56  ;;  %v1963_v6 = vld [vmem:[#allocation12 + $0x88] sm:$0xff]  ;;  %v1962_v9 = vld [vmem:[#allocation12 + $0x80] sm:$0xff] }
 0x150   : > { %v1997_v16 = vpack.c.bf16 %v551_v38, %v550_v32  ;;  %v2007_v48 = vpack.c.bf16 %v575_v59, %v574_v33  ;;  %1176 = vmatpush.bf16.msrb.mxu0 %v1949_v55  ;;  %v1971_v7 = vld [vmem:[#allocation12 + $0xc8] sm:$0xff]  ;;  %v1984_v2 = vld [vmem:[#allocation11 + $0x20] sm:$0xff] }
 0x151   : > { %v1992_v47 = vpack.c.bf16 %v549_v37, %v548_v42  ;;  %v2002_v15 = vpack.c.bf16 %v573_v41, %v572_v43  ;;  %1233 = vmatpush.bf16.msrb.mxu3 %v1973_v24  ;;  %v1981_v17 = vld [vmem:[#allocation11 + $0x8] sm:$0xff] }
 0x152   : > { %2009 = vst [vmem:[#allocation2 + $0x8] sm:$0xff] %v1997_v16   ;;  %1215 = vmatpush.bf16.msrb.mxu2 %v1964_v1 }
 0x153   : > { %1993 = vst [vmem:[#allocation2] sm:$0xff] %v1992_v47   ;;  %1196 = vmatpush.bf16.msrb.mxu1 %v1956_v23 }
 0x154   : > { %2003 = vst [vmem:[#allocation3 + $0x8] sm:$0xff] %v2002_v15   ;;  %1177 = vmatpush.bf16.msrb.mxu0 %v1948_v61 }
 0x155   : > { %2010 = vst [vmem:[#allocation3] sm:$0xff] %v2007_v48   ;;  %1234 = vmatpush.bf16.msrb.mxu3 %v1972_v3 }
 0x156   : > { %1216 = vmatpush.bf16.msrb.mxu2 %v1963_v6 }
 0x157   : > { %1197 = vmatpush.bf16.msrb.mxu1 %v1955_v0 }
 0x158   : > { %1178 = vmatpush.bf16.msrb.mxu0 %v1947_v63 }
 0x159   : > { %v1913_v57 = vld [vmem:[#allocation2 + $0x8] sm:$0xff]  ;;  %1235 = vmatpush.bf16.msrb.mxu3 %v1971_v7 }
 0x15a   : > { %v1912_v54 = vld [vmem:[#allocation2] sm:$0xff]  ;;  %1217 = vmatpush.bf16.msrb.mxu2 %v1962_v9 }
 0x15b   : > { %804 = vmatmul.bf16.vlgmr.msra.gmra.mxu0 %v1912_v54  ;;  %823 = vmatmul.bf16.vlgmr.msra.gmra.mxu1 %v1912_v54 }
 0x15c   : > { %842 = vmatmul.bf16.vlgmr.msra.gmra.mxu2 %v1912_v54  ;;  %861 = vmatmul.bf16.vlgmr.msra.gmra.mxu3 %v1912_v54 }
 0x15d   : > { %1179 = vmatpush.bf16.msrb.mxu0 %v1946_v4  ;;  %1198 = vmatpush.bf16.msrb.mxu1 %v1954_v5 }
 0x15e   : > { %1236 = vmatpush.bf16.msrb.mxu3 %v1970_v11  ;;  %v1978_v11 = vld [vmem:[#allocation3 + $0x8] sm:$0xff] }
 0x161   : > { %1339 = vmatpush.bf16.msra.mxu0 %v1987_v8  ;;  %2011 = vmatpush.bf16.msra.mxu1 %v1987_v8 }
 0x165   : > { %1340 = vmatpush.bf16.msra.mxu0 %v1986_v12  ;;  %2012 = vmatpush.bf16.msra.mxu1 %v1986_v12  ;;  %v1979_v12 = vld [vmem:[#allocation3] sm:$0xff] }
 0x169   : > { %1341 = vmatpush.bf16.msra.mxu0 %v1985_v13  ;;  %2013 = vmatpush.bf16.msra.mxu1 %v1985_v13 }
 0x16b   : > { %809 = vmatmul.bf16.gmra.mxu0 %v1913_v57  ;;  %828 = vmatmul.bf16.gmra.mxu1 %v1913_v57 }
 0x16c   : > { %847 = vmatmul.bf16.gmra.mxu2 %v1913_v57  ;;  %866 = vmatmul.bf16.gmra.mxu3 %v1913_v57 }
 0x16d   : > { %1342 = vmatpush.bf16.msra.mxu0 %v1984_v2  ;;  %2014 = vmatpush.bf16.msra.mxu1 %v1984_v2 }
 0x171   : > { %1343 = vmatpush.bf16.msra.mxu0 %v1983_v58  ;;  %2015 = vmatpush.bf16.msra.mxu1 %v1983_v58 }
 0x175   : > { %1344 = vmatpush.bf16.msra.mxu0 %v1982_v19  ;;  %2016 = vmatpush.bf16.msra.mxu1 %v1982_v19 }
 0x179   : > { %1345 = vmatpush.bf16.msra.mxu0 %v1981_v17  ;;  %2017 = vmatpush.bf16.msra.mxu1 %v1981_v17 }
 0x17d   : > { %1346 = vmatpush.bf16.msra.mxu0 %v1980_v36  ;;  %2018 = vmatpush.bf16.msra.mxu1 %v1980_v36 }
 0x1d8   : > { %v805_v14 = vpop.f32.mrf.mxu0  ;;  %v824_v18 = vpop.f32.mrf.mxu1 }
 0x1d9   : > { %v872_v20 = vmax.f32 %v805_v14, 0.0  ;;  %v873_v21 = vmax.f32 %v824_v18, 0.0 }
 0x1db   : > { %v888_v33 = vmul.f32 %v872_v20, %v872_v20  ;;  %v889_v10 = vmul.f32 %v873_v21, %v873_v21 }
 0x1df   : > { %v843_v22 = vpop.f32.mrf.mxu2  ;;  %v862_v25 = vpop.f32.mrf.mxu3 }
 0x1e0   : > { %v807_v26 = vpop.f32.mrf.mxu0  ;;  %v826_v27 = vpop.f32.mrf.mxu1  ;;  %v874_v59 = vmax.f32 %v843_v22, 0.0  ;;  %v875_v39 = vmax.f32 %v862_v25, 0.0 }
 0x1e1   : > { %v876_v28 = vmax.f32 %v807_v26, 0.0  ;;  %v877_v32 = vmax.f32 %v826_v27, 0.0 }
 0x1e2   : > { %v890_v16 = vmul.f32 %v874_v59, %v874_v59  ;;  %v891_v34 = vmul.f32 %v875_v39, %v875_v39 }
 0x1e3   : > { %v892_v35 = vmul.f32 %v876_v28, %v876_v28  ;;  %v893_v29 = vmul.f32 %v877_v32, %v877_v32 }
 0x1e5   : > { %v908_v37 = vpack.c.bf16 %v892_v35, %v888_v33  ;;  %v909_v38 = vpack.c.bf16 %v893_v29, %v889_v10 }
 0x1e7   : > { %v845_v40 = vpop.f32.mrf.mxu2  ;;  %v864_v41 = vpop.f32.mrf.mxu3  ;;  %1180 = vmatmul.bf16.vlgmr.msrb.gmra.mxu0 %v908_v37  ;;  %1199 = vmatmul.bf16.vlgmr.msrb.gmra.mxu1 %v909_v38 }
 0x1e8   : > { %v878_v42 = vmax.f32 %v845_v40, 0.0  ;;  %v879_v43 = vmax.f32 %v864_v41, 0.0  ;;  %v810_v44 = vpop.f32.mrf.mxu0  ;;  %v829_v45 = vpop.f32.mrf.mxu1 }
 0x1e9   : > { %v880_v49 = vmax.f32 %v810_v44, 0.0  ;;  %v881_v50 = vmax.f32 %v829_v45, 0.0 }
 0x1ea   : > { %v894_v46 = vmul.f32 %v878_v42, %v878_v42  ;;  %v895_v47 = vmul.f32 %v879_v43, %v879_v43 }
 0x1eb   : > { %v896_v56 = vmul.f32 %v880_v49, %v880_v49  ;;  %v897_v57 = vmul.f32 %v881_v50, %v881_v50 }
 0x1ec   : > { %v910_v15 = vpack.c.bf16 %v894_v46, %v890_v16  ;;  %v911_v48 = vpack.c.bf16 %v895_v47, %v891_v34 }
 0x1ee   : > { %1218 = vmatmul.bf16.vlgmr.msrb.gmra.mxu2 %v910_v15  ;;  %1237 = vmatmul.bf16.vlgmr.msrb.gmra.mxu3 %v911_v48 }
 0x1ef   : > { %v848_v51 = vpop.f32.mrf.mxu2  ;;  %v867_v52 = vpop.f32.mrf.mxu3 }
 0x1f0   : > { %v812_v30 = vpop.f32.mrf.mxu0  ;;  %v831_v53 = vpop.f32.mrf.mxu1  ;;  %v882_v62 = vmax.f32 %v848_v51, 0.0  ;;  %v883_v24 = vmax.f32 %v867_v52, 0.0 }
 0x1f1   : > { %v884_v54 = vmax.f32 %v812_v30, 0.0  ;;  %v885_v55 = vmax.f32 %v831_v53, 0.0 }
 0x1f2   : > { %v898_v4 = vmul.f32 %v882_v62, %v882_v62  ;;  %v899_v5 = vmul.f32 %v883_v24, %v883_v24 }
 0x1f3   : > { %v900_v60 = vmul.f32 %v884_v54, %v884_v54  ;;  %v901_v31 = vmul.f32 %v885_v55, %v885_v55 }
 0x1f5   : > { %v912_v61 = vpack.c.bf16 %v900_v60, %v896_v56  ;;  %v913_v23 = vpack.c.bf16 %v901_v31, %v897_v57 }
 0x1f7   : > { %v850_v63 = vpop.f32.mrf.mxu2  ;;  %v869_v0 = vpop.f32.mrf.mxu3  ;;  %1185 = vmatmul.bf16.gmra.mxu0 %v912_v61  ;;  %1204 = vmatmul.bf16.gmra.mxu1 %v913_v23 }
 0x1f8   : > { %v886_v1 = vmax.f32 %v850_v63, 0.0  ;;  %v887_v3 = vmax.f32 %v869_v0, 0.0 }
 0x1fa   : > { %v902_v6 = vmul.f32 %v886_v1, %v886_v1  ;;  %v903_v7 = vmul.f32 %v887_v3, %v887_v3 }
 0x1fc   : > { %v914_v8 = vpack.c.bf16 %v902_v6, %v898_v4  ;;  %v915_v9 = vpack.c.bf16 %v903_v7, %v899_v5 }
 0x1fe   : > { %1223 = vmatmul.bf16.gmra.mxu2 %v914_v8  ;;  %1242 = vmatmul.bf16.gmra.mxu3 %v915_v9 }
 0x207   : > { %1347 = vmatmul.bf16.vlgmr.msra.gmra.mxu0 %v1978_v11  ;;  %1352 = vmatmul.bf16.vlgmr.msra.gmra.mxu1 %v1979_v12 }
 0x264   : > { %v1181_v13 = vpop.f32.mrf.mxu0  ;;  %v1200_v2 = vpop.f32.mrf.mxu1 }
 0x265   : > { %v1201_v44 = vadd.f32 %v1200_v2, %v1181_v13 }
 0x26c   : > { %v1183_v14 = vpop.f32.mrf.mxu0  ;;  %v1202_v18 = vpop.f32.mrf.mxu1 }
 0x26d   : > { %v1203_v57 = vadd.f32 %v1202_v18, %v1183_v14 }
 0x271   : > { %v1219_v22 = vpop.f32.mrf.mxu2  ;;  %v1238_v28 = vpop.f32.mrf.mxu3 }
 0x272   : > { %v1220_v47 = vadd.f32 %v1219_v22, %v1201_v44 }
 0x274   : > { %v1186_v58 = vpop.f32.mrf.mxu0  ;;  %v1205_v19 = vpop.f32.mrf.mxu1  ;;  %v1239_v61 = vadd.f32 %v1238_v28, %v1220_v47 }
 0x275   : > { %v1206_v49 = vadd.f32 %v1205_v19, %v1186_v58 }
 0x279   : > { %v1221_v36 = vpop.f32.mrf.mxu2  ;;  %v2683_v40 = vpop.f32.mrf.mxu3 }
 0x27a   : > { %v1222_v11 = vadd.f32 %v1221_v36, %v1203_v57 }
 0x27c   : > { %v2679_v20 = vpop.f32.mrf.mxu0  ;;  %v2681_v21 = vpop.f32.mrf.mxu1  ;;  %v1241_v28 = vadd.f32 %v2683_v40, %v1222_v11 }
 0x27d   : > { %v1208_v18 = vadd.f32 %v2681_v21, %v2679_v20 }
 0x281   : > { %v1224_v34 = vpop.f32.mrf.mxu2  ;;  %v1243_v24 = vpop.f32.mrf.mxu3 }
 0x282   : > { %v1225_v54 = vadd.f32 %v1224_v34, %v1206_v49 }
 0x284   : > { %v1348_v25 = vpop.f32.mrf.mxu0  ;;  %v1353_v17 = vpop.f32.mrf.mxu1  ;;  %v1244_v3 = vadd.f32 %v1243_v24, %v1225_v54 }
 0x285   : > { %v1902_v26 = vmul.f32 -1.442695, %v1348_v25  ;;  %v1904_v27 = vmul.f32 -1.442695, %v1353_v17 }
 0x287   : > { %2138 = vpow2.f32 %v1902_v26 }
 0x288   : > { %2140 = vpow2.f32 %v1904_v27 }
 0x289   : > { %v1226_v13 = vpop.f32.mrf.mxu2 }
 0x28a   : > { %v1227_v25 = vadd.f32 %v1226_v13, %v1208_v18 }
 0x28c   : > { %v1350_v32 = vpop.f32.mrf.mxu0  ;;  %v1355_v33 = vpop.f32.mrf.mxu1 }
 0x28d   : > { %v2139_v10 = vpop.eup %2138  ;;  %v1903_v35 = vmul.f32 -1.442695, %v1350_v32  ;;  %v1905_v38 = vmul.f32 -1.442695, %v1355_v33 }
 0x28e   : > { %v2141_v29 = vpop.eup %2140  ;;  %v1370_v37 = vadd.f32 1.0, %v2139_v10 }
 0x28f   : > { %v1372_v59 = vadd.f32 1.0, %v2141_v29  ;;  %2142 = vpow2.f32 %v1903_v35  ;;  %v1245_v35 = vpop.f32.mrf.mxu3 }
 0x290   : > { %2144 = vrcp.f32 %v1370_v37  ;;  %v1383_v50 = vand.u32 2147483647, %v1370_v37  ;;  %v1385_v51 = vand.u32 2147483648, %v1370_v37  ;;  %vm1379_vm1 = vweird.f32 %v1370_v37 }
 0x291   : > { %2146 = vrcp.f32 %v1372_v59  ;;  %v1415_v53 = vand.u32 2147483648, %v1372_v59  ;;  %v1413_v56 = vand.u32 2147483647, %v1372_v59  ;;  %vm1409_vm3 = vweird.f32 %v1372_v59 }
 0x292   : > { %2148 = vpow2.f32 %v1905_v38  ;;  %v1386_v23 = vor.u32 1.1754944e-38, %v1385_v51  ;;  %vm1384_vm4 = vcmp.eq.f32.partialorder %v1383_v50, 8.507059e+37 }
 0x293   : > { %v1416_v0 = vor.u32 1.1754944e-38, %v1415_v53  ;;  %vm1414_vm6 = vcmp.eq.f32.partialorder %v1413_v56, 8.507059e+37 }
 0x295   : > { %v2143_v39 = vpop.eup %2142 }
 0x296   : > { %v2145_v41 = vpop.eup %2144  ;;  %v2685_v42 = vadd.f32 1.0, %v2143_v39 }
 0x297   : > { %v2147_v43 = vpop.eup %2146  ;;  %v1375_v45 = vmul.f32 %v2145_v41, %v1370_v37  ;;  %vm1380_vm15 = vweird.f32 %v2145_v41  ;;  %v1246_v37 = vadd.f32 %v1245_v35, %v1227_v25 }
 0x298   : > { %v2149_v16 = vpop.eup %2148  ;;  %v1405_v46 = vmul.f32 %v2147_v43, %v1372_v59  ;;  %2150 = vrcp.f32 %v2685_v42  ;;  %vm1410_vm0 = vweird.f32 %v2147_v43  ;;  %vm1381_vm2 = vmor %vm1379_vm1, %vm1380_vm15  ;;  %v1400_v2 = vand.u32 2147483648, %v2685_v42 }
 0x299   : > { %v1376_v15 = vsub.f32 1.0, %v1375_v45  ;;  %v2688_v48 = vadd.f32 1.0, %v2149_v16  ;;  %vm1411_vm5 = vmor %vm1409_vm3, %vm1410_vm0  ;;  %v1398_v19 = vand.u32 2147483647, %v2685_v42  ;;  %vm1394_vm8 = vweird.f32 %v2685_v42 }
 0x29a   : > { %v1406_v52 = vsub.f32 1.0, %v1405_v46  ;;  %v1401_v20 = vor.u32 1.1754944e-38, %v1400_v2 }
 0x29b   : > { %v1377_v30 = vmul.f32 %v2145_v41, %v1376_v15  ;;  %2152 = vrcp.f32 %v2688_v48  ;;  %v1430_v26 = vand.u32 2147483648, %v2688_v48  ;;  %v1428_v27 = vand.u32 2147483647, %v2688_v48 }
 0x29c   : > { %v1407_v55 = vmul.f32 %v2147_v43, %v1406_v52  ;;  %vm1399_vm11 = vcmp.eq.f32.partialorder %v1398_v19, 8.507059e+37  ;;  %vm1424_vm12 = vweird.f32 %v2688_v48 }
 0x29d   : > { %v1378_v60 = vadd.f32 %v2145_v41, %v1377_v30  ;;  %v1431_v36 = vor.u32 1.1754944e-38, %v1430_v26  ;;  %vm1429_vm14 = vcmp.eq.f32.partialorder %v1428_v27, 8.507059e+37 }
 0x29e   : > { %v2151_v31 = vpop.eup %2150  ;;  %v1408_v62 = vadd.f32 %v2147_v43, %v1407_v55 }
 0x29f   : > { %v1382_v63 = vsel %vm1381_vm2, %v2145_v41, %v1378_v60  ;;  %v1390_v1 = vmul.f32 %v2151_v31, %v2685_v42  ;;  %vm1395_vm7 = vweird.f32 %v2151_v31 }
 0x2a0   : > { %v1387_v4 = vsel %vm1384_vm4, %v1386_v23, %v1382_v63  ;;  %v1412_v5 = vsel %vm1411_vm5, %v2147_v43, %v1408_v62  ;;  %vm1396_vm9 = vmor %vm1394_vm8, %vm1395_vm7 }
 0x2a1   : > { %v2153_v6 = vpop.eup %2152  ;;  %v1438_v7 = vmul.f32 %v1387_v4, %v1239_v61  ;;  %v1417_v8 = vsel %vm1414_vm6, %v1416_v0, %v1412_v5  ;;  %v1391_v9 = vsub.f32 1.0, %v1390_v1 }
 0x2a2   : > { %v1440_v12 = vmul.f32 %v1417_v8, %v1244_v3  ;;  %v1420_v14 = vmul.f32 %v2153_v6, %v2688_v48  ;;  %vm1425_vm10 = vweird.f32 %v2153_v6 }
 0x2a3   : > { %1442 = vst [vmem:[%s2699_s13] sm:$0xff] %v1438_v7  ;;  %v1392_v58 = vmul.f32 %v2151_v31, %v1391_v9  ;;  %vm1426_vm13 = vmor %vm1424_vm12, %vm1425_vm10 }
 0x2a4   : > { %1444 = vst [vmem:[%s2699_s13 + $0x10] sm:$0xff] %v1440_v12  ;;  %v1421_v22 = vsub.f32 1.0, %v1420_v14 }
 0x2a5   : > { %v1393_v17 = vadd.f32 %v2151_v31, %v1392_v58 }
 0x2a6   : > { %v1422_v21 = vmul.f32 %v2153_v6, %v1421_v22 }
 0x2a7   : > { %v1397_v32 = vsel %vm1396_vm9, %v2151_v31, %v1393_v17 }
 0x2a8   : > { %v1402_v33 = vsel %vm1399_vm11, %v1401_v20, %v1397_v32  ;;  %v1423_v10 = vadd.f32 %v2153_v6, %v1422_v21 }
 0x2a9   : > { %v1439_v29 = vmul.f32 %v1402_v33, %v1241_v28 }
 0x2aa   : > { %v1427_v38 = vsel %vm1426_vm13, %v2153_v6, %v1423_v10 }
 0x2ab   : > { %1443 = vst [vmem:[%s2699_s13 + $0x8] sm:$0xff] %v1439_v29  ;;  %v1432_v59 = vsel %vm1429_vm14, %v1431_v36, %v1427_v38 }
 0x2ac   : > { %v1441_v39 = vmul.f32 %v1432_v59, %v1246_v37 }
 0x2ae   : > { %1445 = vst [vmem:[%s2699_s13 + $0x18] sm:$0xff] %v1441_v39 }
 0x2af   : > { %2301 = shalt.err (!%p2298_p0)
}
 0x2b0   : > { %s2377_s7 = smov 128   ;;  %s2378_s30 = smov 8  }
 0x2b1   : > { %2033 = dma.vmem_to_hbm [thread:$0]  (%p2498_p3), %s1461_s15, 512, %s1463_s3, %s1447_s4, %s2377_s7, %s2377_s7, %s2378_s30  }
 0x2b2 PF: > { %s1477_s6 = sand.u32 1, %s2344_s18   ;;  %p2050_p5 = pnand %p1588_p11, %p2458_p6 }
 0x2b3   : > { %s1478_s9 = scalar_lea.sflag [#allocation8], %s1477_s6 }
 0x2b4   : > { %p2051_p7 = pneg %p2050_p5 }
 0x2b6   : > { %2339 = dma.done.wait (%p2051_p7), %s1478_s9, 512  }
 0x2b7   : > { %2341 = vsyncadd (%p2051_p7), %s1478_s9, 4294966784  ;;  %s23_s23 = sadd.s32 1, %s2364_s23   ;;  %s2773_s18 = smov %s2348_s19 }
 0x2b8   : > { %p20_p9 = scmp.ge.s32.totalorder %s23_s23, 4   ;;  %s2774_s19 = smov %s2352_s20 }
 0x2b9   : > { %s2775_s20 = smov %s2514_s27  ;;  %s2776_s21 = smov %s2360_s22 }
 0x2ba   : > { %s2777_s22 = smov %s2779_s10  ;;  %22 = sbr.rel (!%p20_p9) target bundleno = 12 (0xc), region = 107 }
 0x2bf   :  { %1484 = vsyncpa [#allocation7], 1 }
 0x2c0   :  { %1486 = vsyncpa [#allocation7 + $0x1], 1 }
 0x2c1   :  { %1487 = vsyncpa [#allocation10], 1 }
 0x2c2   :  { %1488 = vsyncpa [#allocation13], 1 }
 0x2c3   :  { %1489 = vsyncpa [#allocation8], 1 }
 0x2c4   :  { %1491 = vsyncpa [#allocation8 + $0x1], 1 }

</bundles_post_ra>
